<compile_context>
chip_gen: v7x
topology: tpu7x:2x2x1
jax: 0.10.0
libtpu: 0.0.40
codegen_flags: <defaults>
</compile_context>

<pallas_src>
import jax
import jax.numpy as jnp
from jax.experimental import pallas as pl
from jax.experimental.pallas import tpu as pltpu


def _chomp_copy_kernel(x_ref, o_ref):
    # Straight tile copy; input/output blocks share shape and index map, so the
    # chomped tail is never read except padded lanes of the final edge tile.
    o_ref[...] = x_ref[...]


def _target_block_bytes() -> int:
    """Generation-aware per-block budget (double-buffered in+out => ~4x this)."""
    try:
        vmem = int(pltpu.get_tpu_info().vmem_capacity_bytes)
    except Exception:
        vmem = 64 << 20  # conservative fallback: assume v7x-sized VMEM
    # 128 MiB VMEM (v5e/v6e) -> 12 MiB blocks; 64 MiB (v7x) -> 8 MiB blocks.
    return int(max(2 << 20, min(12 << 20, vmem // 8)))


def chomp1d(x: jax.Array, chomp_size: int, *, _force_pallas: bool = False) -> jax.Array:
    """Pallas equivalent of Chomp1d(chomp_size)(x) for x of shape (N, C, L)."""
    assert chomp_size > 0, "chomp_size must be positive (matches x[..., :-s])"
    n, c, l = x.shape
    l_out = l - chomp_size
    assert l_out > 0, "chomp_size must be smaller than the time dimension"

    itemsize = jnp.dtype(x.dtype).itemsize
    r = n * c

    # ---- small / narrow bypass ---------------------------------------------
    # Fixed pallas_call overhead dominates tiny copies, and l_out < 128 can't
    # be lane-tiled; a plain XLA slice is strictly cheaper (and fuses into the
    # consumer in a real TCN).
    small_bytes = 1 << 20
    if l_out < 128 or (not _force_pallas and r * l_out * itemsize < small_bytes):
        return x[..., :l_out]

    x2 = x.reshape(r, l)  # contiguous reshape, free at the XLA level
    sublane = {4: 8, 2: 16, 1: 32}.get(itemsize, 8)  # dtype-aware packing
    target_block = _target_block_bytes()

    # ---- time (lane) tile: grow first, minimize last-tile remainder ---------
    tl_cap = min(4096, -(-l_out // 128) * 128)                   # lane cap
    tl_cap = min(tl_cap, max(128, (target_block // (sublane * itemsize)) // 128 * 128))
    best_key, tl = None, 128
    for cand in range(128, tl_cap + 1, 128):
        waste = -(-l_out // cand) * cand - l_out  # dead lanes in the edge tile
        key = (waste, -cand)                       # min waste, then biggest tile
        if best_key is None or key < best_key:
            best_key, tl = key, cand

    # ---- row (sublane) tile: fill the remaining block budget ----------------
    rows_budget = max(sublane, target_block // (tl * itemsize))
    rows_budget = max(sublane, (rows_budget // sublane) * sublane)
    tr = r if r <= rows_budget else rows_budget   # full dim or sublane multiple

    n_rows = pl.cdiv(r, tr)
    n_time = pl.cdiv(l_out, tl)

    # ---- keep >= 2 blocks so the v7x megacore can shard the grid ------------
    if n_rows * n_time == 1:
        if r > sublane:
            half = -(-(-(-r // 2)) // sublane) * sublane  # ceil(r/2) -> sublane mult
            if half < r:
                tr = half
                n_rows = pl.cdiv(r, tr)
        if n_rows * n_time == 1 and tl >= 256:
            tl = (tl // 2 // 128) * 128
            n_time = pl.cdiv(l_out, tl)

    block_bytes = tr * tl * itemsize
    try:
        vmem_phys = int(pltpu.get_tpu_info().vmem_capacity_bytes)
    except Exception:
        vmem_phys = 64 << 20
    # Double-buffered in + out ~= 4x block; leave headroom under physical VMEM.
    vmem_limit = int(max(32 << 20, min(vmem_phys * 3 // 4, 4 * block_bytes + (8 << 20))))

    out2 = pl.pallas_call(
        _chomp_copy_kernel,
        out_shape=jax.ShapeDtypeStruct((r, l_out), x.dtype),
        grid_spec=pltpu.PrefetchScalarGridSpec(
            num_scalar_prefetch=0,
            grid=(n_rows, n_time),
            in_specs=[pl.BlockSpec((tr, tl), lambda i, j: (i, j))],
            out_specs=pl.BlockSpec((tr, tl), lambda i, j: (i, j)),
        ),
        compiler_params=pltpu.CompilerParams(
            dimension_semantics=("parallel", "parallel"),
            vmem_limit_bytes=vmem_limit,
        ),
    )(x2)

    return out2.reshape(n, c, l_out)


if __name__ == "__main__":
    key = jax.random.PRNGKey(0)
    k1, k2, k3 = jax.random.split(key, 3)

    # 1) Module-sized tiny input (batch=2, channels=4, seq=16): takes the
    #    XLA-slice bypass (fixed launch overhead would dominate the copy).
    x = jax.random.normal(k1, (2, 4, 16), dtype=jnp.float32)
    y = jax.block_until_ready(chomp1d(x, 3))
    assert y.shape == (2, 4, 13) and y.dtype == x.dtype
    assert jnp.array_equal(y, x[..., :-3])

    # 2) Forced Pallas path, bf16: exercises lane tiling, the single-block
    #    megacore split, and the masked last time tile.
    x2 = jax.random.normal(k2, (2, 8, 1024), dtype=jnp.bfloat16)
    y2 = jax.block_until_ready(chomp1d(x2, 25, _force_pallas=True))
    assert y2.dtype == x2.dtype
    assert jnp.array_equal(y2, x2[..., :-25])

    # 3) Default Pallas path on a larger (but still modest) f32 input:
    #    multi-block grid, big lane-dense tiles.
    x3 = jax.random.normal(k3, (4, 32, 4096), dtype=jnp.float32)
    y3 = jax.block_until_ready(chomp1d(x3, 64))
    assert y3.shape == (4, 32, 4096 - 64)
    assert jnp.array_equal(y3, x3[..., :-64])

    print("KERNEL_OK")
</pallas_src>

<mosaic_0001>
module attributes {stable_mosaic.version = 11 : i64} {
  func.func @_chomp_copy_kernel(%arg0: i32, %arg1: i32, %arg2: memref<16x512xbf16, #tpu.memory_space<vmem>>, %arg3: memref<16x512xbf16, #tpu.memory_space<vmem>>) attributes {dimension_semantics = [#tpu.dimension_semantics<parallel>, #tpu.dimension_semantics<parallel>], iteration_bounds = array<i64: 1, 2>, scalar_prefetch = 0 : i64, scratch_operands = 0 : i64, tpu.core_type = #tpu.core_type<tc>, window_params = [{transform_indices = @transform_0, window_bounds = array<i64: 16, 512>}, {transform_indices = @transform_1, window_bounds = array<i64: 16, 512>}]} {
    %c0 = arith.constant 0 : index
    %c0_0 = arith.constant 0 : index
    %0 = vector.load %arg2[%c0, %c0_0] : memref<16x512xbf16, #tpu.memory_space<vmem>>, vector<16x512xbf16>
    %c0_1 = arith.constant 0 : index
    %c0_2 = arith.constant 0 : index
    %1 = vector.load %arg3[%c0_1, %c0_2] : memref<16x512xbf16, #tpu.memory_space<vmem>>, vector<16x512xbf16>
    tpu.vector_store %arg3[%c0_1, %c0_2], %0 {strides = array<i32>} : memref<16x512xbf16, #tpu.memory_space<vmem>>, vector<16x512xbf16>,
    return
  }
  func.func @transform_0(%arg0: i32, %arg1: i32) -> (i32, i32) {
    %c0_i32 = arith.constant 0 : i32
    return %arg0, %arg1 : i32, i32
  }
  func.func @transform_1(%arg0: i32, %arg1: i32) -> (i32, i32) {
    %c0_i32 = arith.constant 0 : i32
    return %arg0, %arg1 : i32, i32
  }
}

</mosaic_0001>

<bundles_post_ra>
// kernel: tpu_custom_call.1
= control target key start
LH: loop header
LB: loop body
LE: loop exit
PB: predicated region body
PF: predicated region fallthrough
CT: control target
= control target key end

     0   :  { %6 = vsyncpa [#allocation3], 0  ;;  %s660_s0 = inlined_call_operand.hbm [shape: bf16[16,1024], index: 0, kind: input, shape index: {}]   ;;  %s661_s1 = inlined_call_operand.hbm [shape: bf16[16,999], index: 1, kind: output, shape index: {}]  }
   0x1   :  { %8 = vsyncpa [#allocation3 + $0x1], 0 }
   0x2   :  { %9 = vsyncpa [#allocation4], 0 }
   0x3   :  { %11 = vsyncpa [#allocation4 + $0x1], 0  ;;  %s487_s6 = smov 0   ;;  %s489_s7 = smov 0  }
   0x4   :  { %s491_s8 = smov 0   ;;  %s493_s9 = smov 0  }
   0x5   :  { %s495_s10 = smov 0   ;;  %s497_s11 = smov 0  }
   0x6 LB: > { %s270_s12 = sadd.s32 4294967295, %s467_s11   ;;  %s271_s13 = sadd.s32 4294967294, %s467_s11   ;;  %s467_s11 = sphi %s497_s11, %s17_s11   ;;  %s463_s10 = sphi %s495_s10, %s675_s10   ;;  %s459_s9 = sphi %s493_s9, %s674_s9   ;;  %s455_s8 = sphi %s491_s8, %s673_s8   ;;  %s451_s7 = sphi %s489_s7, %s672_s7   ;;  %s447_s6 = sphi %s487_s6, %s671_s6  }
   0x7   : > { %s26_s14 = sadd.s32 1, %s463_s10  ;;  %s38_s15 = sadd.s32 1, %s455_s8 }
   0x8   : > { %p27_p0 = scmp.ge.s32.totalorder %s26_s14, 2  ;;  %p45_p1 = scmp.ne.s32.totalorder %s455_s8, %s451_s7 }
   0x9   : > { %p46_p2 = scmp.eq.s32.totalorder %s467_s11, 0  ;;  %p51_p3 = scmp.ne.s32.totalorder %s451_s7, %s447_s6 }
   0xa   : > { %s677_s14 = smov (%p27_p0, %s26_s14), 0  ;;  %p52_p5 = scmp.eq.s32.totalorder %s270_s12, 0 }
   0xb   : > { %p528_p4 = por %p46_p2, %p45_p1  ;;  %s34_s17 = ssub.s32 %s463_s10, %s677_s14 }
   0xc   : > { %p77_p6 = scmp.eq.s32.totalorder %s270_s12, 1  ;;  %p36_p7 = scmp.eq.s32.totalorder %s34_s17, 0 }
   0xd   : > { %p534_p8 = por %p52_p5, %p51_p3  ;;  %p83_p10 = scmp.eq.s32.totalorder %s271_s13, 1 }
   0xe   : > { %p538_p9 = por %p77_p6, %p45_p1  ;;  %p299_p13 = scmp.lt.s32.totalorder %s467_s11, 2 }
   0xf   : > { %s543_s20 = scalar_select %p36_p7, %s455_s8, %s38_s15  }
  0x10   : > { %s665_s19 = scalar_select %p538_p9, 1, 0 }
  0x11   : > { %p545_p11 = por %p83_p10, %p51_p3  ;;  %s103_s22 = sand.u32 1, %s455_s8  }
  0x12   : > { %s274_s23 = sshll.u32 %s103_s22, 5  ;;  %s285_s24 = sshll.u32 %s463_s10, 8 }
  0x13   : > { %s666_s21 = scalar_select %p545_p11, 1, 0 }
  0x14   : > { %s556_s27 = scalar_lea.hbm %s660_s0, %s285_s24  ;;  %s107_s28 = scalar_lea.vmem [#allocation2], %s274_s23 }
  0x15   : > { %s117_s29 = sshll.u32 %s107_s28, 4  ;;  %p562_p0 = pnand %p299_p13, %p528_p4  ;;  %s558_s29 = int_to_ptr.vmem [resolvable:$true] %s117_s29 }
  0x16   : > { %s566_s2 = scalar_lea.sflag [#allocation3], %s103_s22  ;;  %s355_s3 = scalar_lea.hbm %s556_s27, 512 }
  0x17   : > { %p356_p1 = scmp.ne.s32.totalorder %s556_s27, %s355_s3  ;;  %p357_p2 = pneg %p562_p0 }
  0x18   : > { %s360_s12 = scalar_lea.hbm %s660_s0, 1024  ;;  %p361_p4 = scmp.lt.u32.totalorder %s556_s27, %s660_s0 }
  0x19   : > { %p358_p3 = pnand %p357_p2, %p356_p1  ;;  %p362_p6 = scmp.lt.u32.totalorder %s360_s12, %s355_s3 }
  0x1a   : > { %p364_p10 = scmp.lt.u32.totalorder %s355_s3, %s556_s27 }
  0x1b   : > { %p359_p5 = pneg %p358_p3  ;;  %p363_p7 = por %p362_p6, %p361_p4 }
  0x1d   : > { %p365_p13 = por %p364_p10, %p363_p7 }
  0x1f   : > { %p366_p12 = pnand %p365_p13, %p359_p5 }
  0x21   : > { %369 = shalt.err (!%p366_p12)
}
  0x22   : > { %s370_s16 = scalar_lea.vmem %s558_s29, 512  ;;  %s469_s17 = smov [#allocation2]  }
  0x23   : > { %p371_p1 = scmp.ne.s32.totalorder %s558_s29, %s370_s16  ;;  %s375_s22 = sshll.u32 %s469_s17, 4  ;;  %s376_s22 = int_to_ptr.vmem [resolvable:$false] %s375_s22 }
  0x24   : > { %s377_s23 = scalar_lea.vmem %s376_s22, 1024  ;;  %p378_p9 = scmp.lt.s32.totalorder %s558_s29, %s376_s22 }
  0x25   : > { %p373_p3 = pnand %p371_p1, %p357_p2  ;;  %p379_p4 = scmp.lt.s32.totalorder %s377_s23, %s370_s16 }
  0x27   : > { %p374_p11 = pneg %p373_p3  ;;  %p380_p6 = por %p379_p4, %p378_p9 }
  0x29   : > { %p381_p7 = pnand %p380_p6, %p374_p11 }
  0x2b   : > { %384 = shalt.err (!%p381_p7)
}
  0x2c   : > { %s470_s24 = smov 512   ;;  %s471_s25 = smov 256  }
  0x2d   : > { %s472_s26 = smov 16   ;;  %p277_p12 = scmp.ge.s32.totalorder %s467_s11, 1 }
  0x2e   : > { %294 = dma.hbm_to_vmem [thread:$0]  (!%p562_p0), %s556_s27, 512, %s558_s29, %s566_s2, %s470_s24, %s471_s25, %s472_s26  }
  0x2f   : > { %p125_p2 = scmp.lt.s32.totalorder %s467_s11, 3 }
  0x31   : > { %p126_p5 = pnand %p277_p12, %p125_p2 }
  0x32   : > { %s597_s28 = sand.u32 (!%p126_p5), 1, %s451_s7  }
  0x33   : > { %129 = sbr.rel (%p126_p5) target bundleno = 87 (0x57), region = 24  ;;  %s278_s3 = sshll.u32 (!%p126_p5), %s597_s28, 5 }
  0x34   : > { %s132_s4 = scalar_lea.sflag (!%p126_p5), [#allocation3], %s597_s28  ;;  %s135_s5 = scalar_lea.vmem (!%p126_p5), [#allocation2], %s278_s3 }
  0x3a   : > { %438 = dma.done.wait (%p534_p8), %s132_s4, 512  }
  0x3b   : > { %440 = vsyncadd (%p534_p8), %s132_s4, 4294966784  ;;  %s153_s27 = scalar_lea.vmem [#allocation5], %s278_s3  ;;  %s286_s30 = sshll.u32 %s459_s9, 8  ;;  %v158_v0 = vld [vmem:[%s135_s5] sm:$0xff]  ;;  %v159_v1 = vld [vmem:[%s135_s5 + $0x8] sm:$0xff] }
  0x3c   : > { %s183_s29 = sshll.u32 %s153_s27, 4  ;;  %s611_s13 = scalar_lea.hbm %s661_s1, %s286_s30  ;;  %v160_v2 = vld [vmem:[%s135_s5 + $0x10] sm:$0xff]  ;;  %162 = vst [vmem:[%s153_s27] sm:$0xff] %v158_v0  ;;  %163 = vst [vmem:[%s153_s27 + $0x8] sm:$0xff] %v159_v1  ;;  %v161_v3 = vld [vmem:[%s135_s5 + $0x18] sm:$0xff]  ;;  %s606_s29 = int_to_ptr.vmem [resolvable:$true] %s183_s29 }
  0x3d   : > { %164 = vst [vmem:[%s153_s27 + $0x10] sm:$0xff] %v160_v2  ;;  %165 = vst [vmem:[%s153_s27 + $0x18] sm:$0xff] %v161_v3  ;;  %s167_s18 = scalar_lea.sflag [#allocation4], %s597_s28  ;;  %s385_s9 = scalar_lea.vmem %s606_s29, 512 }
  0x3e   : > { %p386_p8 = scmp.ne.s32.totalorder %s606_s29, %s385_s9  ;;  %p668_p9 = scmp.ne.s32.totalorder %s665_s19, 0 }
  0x3f   : > { %s473_s15 = smov [#allocation5]  }
  0x40   : > { %p387_p11 = pnand %p386_p8, %p668_p9  ;;  %s389_s16 = sshll.u32 %s473_s15, 4  ;;  %s390_s16 = int_to_ptr.vmem [resolvable:$false] %s389_s16 }
  0x41   : > { %s391_s17 = scalar_lea.vmem %s390_s16, 1024  ;;  %p392_p10 = scmp.lt.s32.totalorder %s606_s29, %s390_s16 }
  0x42   : > { %p388_p0 = pneg %p387_p11  ;;  %p393_p13 = scmp.lt.s32.totalorder %s391_s17, %s385_s9 }
  0x44   : > { %p394_p1 = por %p393_p13, %p392_p10 }
  0x46   : > { %p395_p3 = pnand %p394_p1, %p388_p0 }
  0x48   : > { %398 = shalt.err (!%p395_p3)
}
  0x49   : > { %s399_s22 = scalar_lea.hbm %s611_s13, 512  ;;  %s403_s25 = scalar_lea.hbm %s661_s1, 1024 }
  0x4a   : > { %p400_p4 = scmp.ne.s32.totalorder %s611_s13, %s399_s22  ;;  %p404_p12 = scmp.lt.u32.totalorder %s611_s13, %s661_s1 }
  0x4b   : > { %p405_p2 = scmp.lt.u32.totalorder %s403_s25, %s399_s22  ;;  %p407_p8 = scmp.lt.u32.totalorder %s399_s22, %s611_s13 }
  0x4c   : > { %p401_p6 = pnand %p400_p4, %p668_p9 }
  0x4d   : > { %p406_p5 = por %p405_p2, %p404_p12 }
  0x4e   : > { %p402_p7 = pneg %p401_p6 }
  0x4f   : > { %p408_p11 = por %p407_p8, %p406_p5 }
  0x51   : > { %p409_p0 = pnand %p408_p11, %p402_p7 }
  0x53   : > { %412 = shalt.err (!%p409_p0)
}
  0x54   : > { %s474_s4 = smov 256   ;;  %s475_s5 = smov 512  }
  0x55   : > { %s476_s27 = smov 16  }
  0x56   : > { %289 = dma.vmem_to_hbm [thread:$0]  (%p668_p9), %s606_s29, 512, %s611_s13, %s167_s18, %s474_s4, %s475_s5, %s476_s27  }
  0x57 PF: > { %s198_s30 = sand.u32 1, %s447_s6   ;;  %p669_p10 = scmp.ne.s32.totalorder %s666_s21, 0 }
  0x58   : > { %p670_p13 = scmp.ge.s32.totalorder %s467_s11, 2  ;;  %s199_s2 = scalar_lea.sflag [#allocation4], %s198_s30 }
  0x5a   : > { %p296_p1 = pnand %p670_p13, %p669_p10 }
  0x5c   : > { %442 = dma.done.wait (!%p296_p1), %s199_s2, 512  }
  0x5d   : > { %444 = vsyncadd (!%p296_p1), %s199_s2, 4294966784  ;;  %s17_s11 = sadd.s32 1, %s467_s11   ;;  %s671_s6 = smov %s451_s7 }
  0x5e   : > { %p14_p3 = scmp.ge.s32.totalorder %s17_s11, 4   ;;  %s672_s7 = smov %s455_s8 }
  0x5f   : > { %s673_s8 = smov %s543_s20  ;;  %s674_s9 = smov %s463_s10 }
  0x60   : > { %s675_s10 = smov %s677_s14  ;;  %16 = sbr.rel (!%p14_p3) target bundleno = 6 (0x6), region = 69 }
  0x67   :  { %204 = vsyncpa [#allocation3], 1 }
  0x68   :  { %206 = vsyncpa [#allocation3 + $0x1], 1 }
  0x69   :  { %207 = vsyncpa [#allocation4], 1 }
  0x6a   :  { %209 = vsyncpa [#allocation4 + $0x1], 1 }

</bundles_post_ra>
